<compile_context>
chip_gen: v5e
topology: v5e:2x2
jax: 0.10.0
libtpu: 0.0.40
codegen_flags: <defaults>
</compile_context>

<pallas_src>
import jax
import jax.numpy as jnp
from jax.experimental import pallas as pl
from jax.experimental.pallas import tpu as pltpu


# --------------------------------------------------------------------------- #
# Kernel
# --------------------------------------------------------------------------- #
def _grad_kernel(x_ref, w_ref, wt_ref, b_ref, o_ref, acc_ref):
    # x_ref:  (TB, Dp)      batch tile (resident across the h axis)
    # w_ref:  (Dp, TH)      forward-weight H-tile
    # wt_ref: (TH, Dp)      precomputed W^T H-tile (backward matmul, no xpose)
    # b_ref:  (1, TH)       f32 bias H-tile
    # o_ref:  (TB, Dp)      output tile (written on the last h step)
    # acc_ref:(TB, Dp) f32  accumulator scratch
    h = pl.program_id(1)

    @pl.when(h == 0)
    def _():
        acc_ref[...] = jnp.zeros_like(acc_ref)

    x = x_ref[...]

    # forward pre-activation over this H tile (MXU, f32 accumulation)
    z = jnp.dot(x, w_ref[...], preferred_element_type=jnp.float32) + b_ref[...]

    # tanh on the EUP, derivative on the VPU, all in f32
    t = jnp.tanh(z)
    s = 1.0 - t * t

    # backward: acc += s @ W_tile^T  -- wt_ref is already transposed, so this
    # is a plain (TB,TH)@(TH,Dp) MXU matmul with no in-kernel transpose.
    s_mm = s.astype(wt_ref.dtype) if wt_ref.dtype != s.dtype else s
    acc_ref[...] += jnp.dot(s_mm, wt_ref[...],
                            preferred_element_type=jnp.float32)

    @pl.when(h == pl.num_programs(1) - 1)
    def _():
        o_ref[...] = acc_ref[...].astype(o_ref.dtype)


# --------------------------------------------------------------------------- #
# Tiling / VMEM policy
# --------------------------------------------------------------------------- #
def _ceil_to(n, m):
    return ((n + m - 1) // m) * m


def _vmem_limit_bytes():
    """Per-generation scoped VMEM limit."""
    try:
        cap = int(pltpu.get_tpu_info().vmem_capacity_bytes)
    except Exception:
        cap = 64 * 1024 * 1024  # conservative fallback (safe on v7x)
    if cap >= 128 * 1024 * 1024:
        return 96 * 1024 * 1024                 # v5e / v6e: 128 MiB physical
    return max(32 * 1024 * 1024, int(cap * 0.625))  # v7x: ~40 MiB of 64 MiB


def _vmem_bytes(tile_b, tile_h, dp, x_bytes, w_bytes, out_bytes):
    """Conservative VMEM estimate for one grid step (double-buffered I/O)."""
    xb = 2 * tile_b * dp * x_bytes          # x tile (double-buffered)
    ob = 2 * tile_b * dp * out_bytes        # output tile
    wb = 2 * dp * tile_h * w_bytes          # W H-tile
    wtb = 2 * tile_h * dp * w_bytes         # W^T H-tile
    bb = 2 * tile_h * 4                     # f32 bias H-tile
    accb = tile_b * dp * 4                  # f32 accumulator scratch
    tmpb = 3 * tile_b * tile_h * 4          # z / t / s f32 temporaries
    return xb + ob + wb + wtb + bb + accb + tmpb


def _pick_tiles(B, dp, hp, x_bytes, w_bytes, out_bytes, budget):
    """VMEM-budgeted, dtype-aware (tile_b, tile_h) selection."""
    # sub-32-bit dtypes pack along sublanes: keep tiles at least one full vreg
    min_tb = 8 if x_bytes >= 4 else (16 if x_bytes == 2 else 32)
    b_cands = [t for t in (1024, 512, 256, 128, 64, 32, 16, 8) if t >= min_tb]
    h_cands = sorted({h for h in (hp, 4096, 2048, 1024, 512, 256, 128)
                      if h <= hp and hp % h == 0}, reverse=True)

    def fits(tb, th):
        return _vmem_bytes(tb, th, dp, x_bytes, w_bytes, out_bytes) <= budget

    def pick(pred):
        for tb in b_cands:
            if not pred(tb):
                continue
            for th in h_cands:
                if fits(tb, th):
                    return tb, th
        return None

    preds = (
        lambda tb: B % tb == 0 and (B // tb) % 2 == 0,  # exact + even (v7x megacore)
        lambda tb: B % tb == 0,                          # exact divisor
        lambda tb: (-(-B // tb)) % 2 == 0,               # padded, even step count
        lambda tb: True,                                 # anything that fits
    )
    for pred in preds:
        got = pick(pred)
        if got is not None:
            return got
    return b_cands[-1], h_cands[-1]


# --------------------------------------------------------------------------- #
# Wrapper
# --------------------------------------------------------------------------- #
def gradient_wrapper_forward(x, w, b, *, tile_b=None, tile_h=None,
                             use_bf16_matmul=False):
    """Pallas implementation of GradientWrapper(tanh(x @ W + b)).forward(x)."""
    B, D = x.shape
    Dw, H = w.shape
    assert D == Dw and b.shape == (H,)
    out_dtype = x.dtype

    if use_bf16_matmul:
        # Opt-in: bf16 MXU operands (v6e/v7x fast path); changes numerics.
        x = x.astype(jnp.bfloat16)
        w = w.astype(jnp.bfloat16)

    # Pad D and H to multiples of 128: lane-dense output stores + aligned MXU
    # tiles. Zero padding is mathematically inert for this expression.
    Dp = _ceil_to(max(D, 128), 128)
    Hp = _ceil_to(max(H, 128), 128)
    if Dp != D:
        x = jnp.pad(x, ((0, 0), (0, Dp - D)))
        w = jnp.pad(w, ((0, Dp - D), (0, 0)))
    if Hp != H:
        w = jnp.pad(w, ((0, 0), (0, Hp - H)))
        b = jnp.pad(b, (0, Hp - H))

    # One-time host/XLA-side transforms (hoisted out of the kernel).
    w_t = jnp.transpose(w)                       # (Hp, Dp)
    b_row = b.reshape(1, Hp).astype(jnp.float32)

    vmem_limit = _vmem_limit_bytes()
    x_bytes = jnp.dtype(x.dtype).itemsize
    w_bytes = jnp.dtype(w.dtype).itemsize
    out_bytes = jnp.dtype(out_dtype).itemsize
    if tile_b is None or tile_h is None:
        tb_auto, th_auto = _pick_tiles(B, Dp, Hp, x_bytes, w_bytes, out_bytes,
                                       int(vmem_limit * 0.8))
        tile_b = tile_b if tile_b is not None else tb_auto
        tile_h = tile_h if tile_h is not None else th_auto
    assert Hp % tile_h == 0

    # Pad the batch to the chosen tile instead of a full-batch fallback.
    Bp = _ceil_to(B, tile_b)
    if Bp != B:
        x = jnp.pad(x, ((0, Bp - B), (0, 0)))

    grid = (Bp // tile_b, Hp // tile_h)

    out = pl.pallas_call(
        _grad_kernel,
        out_shape=jax.ShapeDtypeStruct((Bp, Dp), out_dtype),
        grid_spec=pltpu.PrefetchScalarGridSpec(
            num_scalar_prefetch=0,
            grid=grid,
            in_specs=[
                # x tile: constant across the h axis (kept resident)
                pl.BlockSpec((tile_b, Dp), lambda i, h: (i, 0)),
                # W H-tile for the forward matmul
                pl.BlockSpec((Dp, tile_h), lambda i, h: (0, h)),
                # W^T H-tile for the backward matmul (no in-kernel transpose)
                pl.BlockSpec((tile_h, Dp), lambda i, h: (h, 0)),
                # f32 bias H-tile
                pl.BlockSpec((1, tile_h), lambda i, h: (0, h)),
            ],
            out_specs=pl.BlockSpec((tile_b, Dp), lambda i, h: (i, 0)),
            scratch_shapes=[pltpu.VMEM((tile_b, Dp), jnp.float32)],
        ),
        compiler_params=pltpu.CompilerParams(
            dimension_semantics=("parallel", "arbitrary"),
            vmem_limit_bytes=vmem_limit,
        ),
    )(x, w, w_t, b_row)

    if Bp != B or Dp != D:
        out = out[:B, :D]
    return out


# --------------------------------------------------------------------------- #
# Self-test
# --------------------------------------------------------------------------- #
if __name__ == "__main__":
    key = jax.random.PRNGKey(0)
    kx, kw, kb = jax.random.split(key, 3)

    # Modest shapes: the auto-picked tile is 256 rows -> 2 even grid steps.
    B, D, H = 512, 128, 128
    x = jax.random.normal(kx, (B, D), dtype=jnp.float32)
    w = jax.random.normal(kw, (D, H), dtype=jnp.float32) * 0.05
    b = jax.random.normal(kb, (H,), dtype=jnp.float32) * 0.1

    out = gradient_wrapper_forward(x, w, b)
    out = jax.block_until_ready(out)

    # reference: autodiff of sum(expression(x)) — same semantics as
    # torch.autograd.grad(output, x, grad_outputs=ones_like(output))
    ref = jax.grad(lambda xx: jnp.sum(jnp.tanh(xx @ w + b)))(x)
    assert out.shape == x.shape and out.dtype == x.dtype
    assert jnp.allclose(out, ref, atol=1e-4, rtol=1e-4)

    print("KERNEL_OK")
</pallas_src>

<mosaic_0001>
module attributes {stable_mosaic.version = 11 : i64} {
  func.func @_grad_kernel(%arg0: i32, %arg1: i32, %arg2: memref<256x128xf32, #tpu.memory_space<vmem>>, %arg3: memref<128x128xf32, #tpu.memory_space<vmem>>, %arg4: memref<128x128xf32, #tpu.memory_space<vmem>>, %arg5: memref<1x128xf32, #tpu.memory_space<vmem>>, %arg6: memref<256x128xf32, #tpu.memory_space<vmem>>, %arg7: memref<256x128xf32, #tpu.memory_space<vmem>>) attributes {dimension_semantics = [#tpu.dimension_semantics<parallel>, #tpu.dimension_semantics<arbitrary>], iteration_bounds = array<i64: 2, 1>, scalar_prefetch = 0 : i64, scratch_operands = 1 : i64, tpu.core_type = #tpu.core_type<tc>, window_params = [{transform_indices = @transform_0, window_bounds = array<i64: 256, 128>}, {transform_indices = @transform_1, window_bounds = array<i64: 128, 128>}, {transform_indices = @transform_2, window_bounds = array<i64: 128, 128>}, {transform_indices = @transform_3, window_bounds = array<i64: 1, 128>}, {transform_indices = @transform_4, window_bounds = array<i64: 256, 128>}]} {
    %c0_i32 = arith.constant 0 : i32
    %0 = arith.cmpi eq, %arg1, %c0_i32 : i32
    %1 = arith.extui %0 : i1 to i32
    %c0_i32_0 = arith.constant 0 : i32
    %2 = arith.cmpi ne, %1, %c0_i32_0 : i32
    scf.if %2 {
      %cst_16 = arith.constant 0.000000e+00 : f32
      %21 = vector.broadcast %cst_16 : f32 to vector<256x128xf32>
      %c0_17 = arith.constant 0 : index
      %c0_18 = arith.constant 0 : index
      %22 = vector.load %arg7[%c0_17, %c0_18] : memref<256x128xf32, #tpu.memory_space<vmem>>, vector<256x128xf32>
      tpu.vector_store %arg7[%c0_17, %c0_18], %21 {strides = array<i32>} : memref<256x128xf32, #tpu.memory_space<vmem>>, vector<256x128xf32>,
    } else {
    }
    %c0 = arith.constant 0 : index
    %c0_1 = arith.constant 0 : index
    %3 = vector.load %arg2[%c0, %c0_1] : memref<256x128xf32, #tpu.memory_space<vmem>>, vector<256x128xf32>
    %c0_2 = arith.constant 0 : index
    %c0_3 = arith.constant 0 : index
    %4 = vector.load %arg3[%c0_2, %c0_3] : memref<128x128xf32, #tpu.memory_space<vmem>>, vector<128x128xf32>
    %cst = arith.constant dense<0.000000e+00> : vector<256x128xf32>
    %5 = tpu.matmul %3, %4, %cst {dimension_numbers = #tpu.dot_dimension_numbers<[1], [0], [0], [1], [0, 0, 1, 1], [], []>} : vector<256x128xf32>, vector<128x128xf32>, vector<256x128xf32> -> vector<256x128xf32>
    %c0_4 = arith.constant 0 : index
    %c0_5 = arith.constant 0 : index
    %6 = vector.load %arg5[%c0_4, %c0_5] : memref<1x128xf32, #tpu.memory_space<vmem>>, vector<1x128xf32>
    %7 = vector.broadcast %6 : vector<1x128xf32> to vector<256x128xf32>
    %8 = arith.addf %5, %7 : vector<256x128xf32>
    %9 = math.tanh %8 : vector<256x128xf32>
    %10 = arith.mulf %9, %9 : vector<256x128xf32>
    %cst_6 = arith.constant 1.000000e+00 : f32
    %11 = vector.broadcast %cst_6 : f32 to vector<256x128xf32>
    %12 = arith.subf %11, %10 : vector<256x128xf32>
    %c0_7 = arith.constant 0 : index
    %c0_8 = arith.constant 0 : index
    %13 = vector.load %arg7[%c0_7, %c0_8] : memref<256x128xf32, #tpu.memory_space<vmem>>, vector<256x128xf32>
    %c0_9 = arith.constant 0 : index
    %c0_10 = arith.constant 0 : index
    %14 = vector.load %arg4[%c0_9, %c0_10] : memref<128x128xf32, #tpu.memory_space<vmem>>, vector<128x128xf32>
    %cst_11 = arith.constant dense<0.000000e+00> : vector<256x128xf32>
    %15 = tpu.matmul %12, %14, %cst_11 {dimension_numbers = #tpu.dot_dimension_numbers<[1], [0], [0], [1], [0, 0, 1, 1], [], []>} : vector<256x128xf32>, vector<128x128xf32>, vector<256x128xf32> -> vector<256x128xf32>
    %16 = arith.addf %13, %15 : vector<256x128xf32>
    %c0_12 = arith.constant 0 : index
    %c0_13 = arith.constant 0 : index
    %17 = vector.load %arg7[%c0_12, %c0_13] : memref<256x128xf32, #tpu.memory_space<vmem>>, vector<256x128xf32>
    tpu.vector_store %arg7[%c0_12, %c0_13], %16 {strides = array<i32>} : memref<256x128xf32, #tpu.memory_space<vmem>>, vector<256x128xf32>,
    %c0_i32_14 = arith.constant 0 : i32
    %18 = arith.cmpi eq, %arg1, %c0_i32_14 : i32
    %19 = arith.extui %18 : i1 to i32
    %c0_i32_15 = arith.constant 0 : i32
    %20 = arith.cmpi ne, %19, %c0_i32_15 : i32
    scf.if %20 {
      %c0_16 = arith.constant 0 : index
      %c0_17 = arith.constant 0 : index
      %21 = vector.load %arg7[%c0_16, %c0_17] : memref<256x128xf32, #tpu.memory_space<vmem>>, vector<256x128xf32>
      %c0_18 = arith.constant 0 : index
      %c0_19 = arith.constant 0 : index
      %22 = vector.load %arg6[%c0_18, %c0_19] : memref<256x128xf32, #tpu.memory_space<vmem>>, vector<256x128xf32>
      tpu.vector_store %arg6[%c0_18, %c0_19], %21 {strides = array<i32>} : memref<256x128xf32, #tpu.memory_space<vmem>>, vector<256x128xf32>,
    } else {
    }
    return
  }
  func.func @transform_0(%arg0: i32, %arg1: i32) -> (i32, i32) {
    %c0_i32 = arith.constant 0 : i32
    %c0_i32_0 = arith.constant 0 : i32
    return %arg0, %c0_i32 : i32, i32
  }
  func.func @transform_1(%arg0: i32, %arg1: i32) -> (i32, i32) {
    %c0_i32 = arith.constant 0 : i32
    %c0_i32_0 = arith.constant 0 : i32
    return %c0_i32, %arg1 : i32, i32
  }
  func.func @transform_2(%arg0: i32, %arg1: i32) -> (i32, i32) {
    %c0_i32 = arith.constant 0 : i32
    %c0_i32_0 = arith.constant 0 : i32
    return %arg1, %c0_i32 : i32, i32
  }
  func.func @transform_3(%arg0: i32, %arg1: i32) -> (i32, i32) {
    %c0_i32 = arith.constant 0 : i32
    %c0_i32_0 = arith.constant 0 : i32
    return %c0_i32, %arg1 : i32, i32
  }
  func.func @transform_4(%arg0: i32, %arg1: i32) -> (i32, i32) {
    %c0_i32 = arith.constant 0 : i32
    %c0_i32_0 = arith.constant 0 : i32
    return %arg0, %c0_i32 : i32, i32
  }
}

</mosaic_0001>

<bundles_post_ra>
// kernel: tpu_custom_call.1
= control target key start
LH: loop header
LB: loop body
LE: loop exit
PB: predicated region body
PF: predicated region fallthrough
CT: control target
= control target key end

     0   :  { %s1696_s0 = inlined_call_operand.hbm [shape: f32[512,128], index: 0, kind: input, shape index: {}]   ;;  %s1697_s1 = inlined_call_operand.hbm [shape: f32[128,128], index: 1, kind: input, shape index: {}]   ;;  %s1698_s2 = inlined_call_operand.hbm [shape: f32[128,128], index: 2, kind: input, shape index: {}]   ;;  %s1699_s3 = inlined_call_operand.vmem [shape: f32[1,128], index: 3, kind: input, shape index: {}]   ;;  %s1700_s4 = inlined_call_operand.hbm [shape: f32[512,128], index: 4, kind: output, shape index: {}]  }
   0x1   :  { %1702 = sst [smem:[#allocation13_spill]] %s1697_s1 }
   0x2   :  { %9 = vsyncpa [#allocation4], 0 }
   0x3   :  { %11 = vsyncpa [#allocation4 + $0x1], 0 }
   0x4   :  { %12 = vsyncpa [#allocation7], 0 }
   0x5   :  { %13 = vsyncpa [#allocation5], 0 }
   0x6   :  { %15 = vsyncpa [#allocation5 + $0x1], 0  ;;  %s1431_s15 = smov 0   ;;  %s1433_s16 = smov 0  }
   0x7   :  { %s1435_s17 = smov 0   ;;  %s1437_s18 = smov 0  }
   0x8   :  { %s1439_s19 = smov 0   ;;  %s1441_s20 = smov 0  }
   0x9 LB: > { %s1016_s21 = sadd.s32 4294967295, %s1398_s20   ;;  %s1017_s22 = sadd.s32 4294967294, %s1398_s20   ;;  %s1398_s20 = sphi %s1441_s20, %s21_s20   ;;  %s1394_s19 = sphi %s1439_s19, %s1714_s19   ;;  %s1390_s18 = sphi %s1437_s18, %s1713_s18   ;;  %s1386_s17 = sphi %s1435_s17, %s1712_s17   ;;  %s1382_s16 = sphi %s1433_s16, %s1711_s16   ;;  %s1378_s15 = sphi %s1431_s15, %s1710_s15  }
   0xa   : > { %p53_p0 = scmp.ne.s32.totalorder %s1382_s16, %s1378_s15  ;;  %p1467_p1 = scmp.eq.s32.totalorder %s1016_s21, 0 }
   0xb   : > { %p161_p2 = scmp.eq.s32.totalorder %s1017_s22, 1  ;;  %p1018_p4 = scmp.ge.s32.totalorder %s1398_s20, 1 }
   0xc   : > { %p1473_p3 = por %p1467_p1, %p53_p0  ;;  %p168_p6 = scmp.lt.s32.totalorder %s1398_s20, 3 }
   0xd   : > { %p1478_p5 = por %p161_p2, %p53_p0  ;;  %s1706_s1 = sld [smem:[#allocation13_spill]] }
   0xe   : > { %p1486_p7 = pnand %p1018_p4, %p168_p6  ;;  %s1400_s30 = smov [#allocation6]  }
   0xf   : > { %s183_s5 = sshll.u32 %s1400_s30, 4  ;;  %p1022_p10 = scmp.ge.s32.totalorder %s1398_s20, 2  ;;  %s184_s5 = int_to_ptr.vmem [resolvable:$true] %s183_s5 }
  0x10   : > { %p1082_p8 = pneg %p1486_p7  ;;  %s198_s8 = sshll.u32 %s1698_s2, 4  ;;  %s199_s8 = int_to_ptr.hbm [resolvable:$true] %s198_s8 }
  0x11   : > { %s1701_s9 = smov 128   ;;  %s1402_s10 = smov 8  }
  0x12   : > { %p1083_p9 = pnand %p1082_p8, %p1467_p1  ;;  %s1403_s11 = smov [#allocation8]  }
  0x13   : > { %s181_s28 = sshll.u32 %s1706_s1, 4  ;;  %s200_s12 = sshll.u32 %s1403_s11, 4  ;;  %s182_s28 = int_to_ptr.hbm [resolvable:$true] %s181_s28  ;;  %s201_s12 = int_to_ptr.vmem [resolvable:$true] %s200_s12 }
  0x14   : > { %1085 = dma.hbm_to_vmem [thread:$0]  (!%p1083_p9), %s182_s28, 2048, %s184_s5, [#allocation7], %s1701_s9, %s1701_s9, %s1402_s10  }
  0x15   : > { %1088 = dma.hbm_to_vmem [thread:$0]  (!%p1083_p9), %s199_s8, 2048, %s201_s12, [#allocation7], %s1701_s9, %s1701_s9, %s1402_s10  }
  0x16   : > { %p155_p11 = scmp.eq.s32.totalorder %s1016_s21, 1  ;;  %s33_s13 = sadd.s32 1, %s1394_s19 }
  0x17   : > { %p35_p12 = scmp.ge.s32.totalorder %s33_s13, 2  ;;  %s40_s14 = sadd.s32 1, %s1386_s17 }
  0x18   : > { %p47_p13 = scmp.ne.s32.totalorder %s1386_s17, %s1382_s16  ;;  %p48_p0 = scmp.eq.s32.totalorder %s1398_s20, 0 }
  0x19   : > { %s1716_s13 = smov (%p35_p12, %s33_s13), 0  ;;  %p1099_p4 = scmp.lt.s32.totalorder %s1398_s20, 2 }
  0x1a   : > { %p1513_p2 = por %p155_p11, %p47_p13  ;;  %s37_s26 = ssub.s32 %s1394_s19, %s1716_s13 }
  0x1b   : > { %s220_s27 = sand.u32 1, %s1386_s17   ;;  %p38_p6 = scmp.eq.s32.totalorder %s37_s26, 0 }
  0x1c   : > { %p49_p8 = por %p48_p0, %p47_p13  ;;  %s1023_s28 = sshll.u32 %s220_s27, 8 }
  0x1d   : > { %s1036_s21 = sshll.u32 %s1394_s19, 8  ;;  %s224_s11 = scalar_lea.vmem [#allocation3], %s1023_s28 }
  0x1e   : > { %s1523_s30 = scalar_select %p38_p6, %s1386_s17, %s40_s14  }
  0x1f   : > { %s229_s7 = scalar_lea.hbm %s1696_s0, %s1036_s21  ;;  %s232_s12 = sshll.u32 %s224_s11, 4  ;;  %s233_s12 = int_to_ptr.vmem [resolvable:$true] %s232_s12 }
  0x20   : > { %s230_s8 = sshll.u32 %s229_s7, 4  ;;  %p1090_p9 = pnand %p1099_p4, %p49_p8  ;;  %s231_s8 = int_to_ptr.hbm [resolvable:$true] %s230_s8 }
  0x21   : > { %s221_s9 = scalar_lea.sflag [#allocation4], %s220_s27  ;;  %s1709_s1 = smov 128  }
  0x22   : > { %1092 = dma.hbm_to_vmem [thread:$0]  (!%p1090_p9), %s231_s8, 4096, %s233_s12, %s221_s9, %s1709_s1, %s1709_s1, %s1402_s10  }
  0x23   : > { %244 = sbr.rel (%p1486_p7) target bundleno = 476 (0x1dc), region = 36  ;;  %s1536_s14 = sand.u32 (!%p1486_p7), 1, %s1382_s16  }
  0x24   : > { %s1027_s26 = sshll.u32 (!%p1486_p7), %s1536_s14, 8  ;;  %s247_s28 = scalar_lea.sflag (!%p1486_p7), [#allocation4], %s1536_s14 }
  0x25   : > { %s1542_s21 = scalar_lea.vmem (!%p1486_p7), [#allocation3], %s1027_s26 }
  0x28   : > { %1365 = dma.done.wait (%p1473_p3), %s247_s28, 4096  }
  0x29   : > { %1367 = vsyncadd (%p1473_p3), %s247_s28, 4294963200 }
  0x2a   : > { %1369 = dma.done.wait (%p1467_p1), [#allocation7], 4096  }
  0x2b   : > { %1371 = vsyncadd (%p1467_p1), [#allocation7], 4294963200  ;;  %v378_v0 = vld [vmem:[#allocation6 + $0x78] sm:$0xff]  ;;  %v377_v1 = vld [vmem:[#allocation6 + $0x70] sm:$0xff]  ;;  %s1623_s24 = scalar_lea.vmem [#allocation9], %s1027_s26  ;;  %s1037_s29 = sshll.u32 %s1390_s18, 8 }
  0x2c   : > { %1038 = vmatpush.msra.mxu2 %v378_v0  ;;  %383 = vmatpush.msra.mxu0 %v378_v0  ;;  %v376_v2 = vld [vmem:[#allocation6 + $0x68] sm:$0xff]  ;;  %v375_v3 = vld [vmem:[#allocation6 + $0x60] sm:$0xff]  ;;  %v374_v4 = vld [vmem:[#allocation6 + $0x58] sm:$0xff]  ;;  %s896_s27 = scalar_lea.hbm %s1700_s4, %s1037_s29  ;;  %s897_s5 = sshll.u32 %s1623_s24, 4  ;;  %s898_s5 = int_to_ptr.vmem [resolvable:$true] %s897_s5 }
  0x2d   : > { %v373_v5 = vld [vmem:[#allocation6 + $0x50] sm:$0xff]  ;;  %v372_v6 = vld [vmem:[#allocation6 + $0x48] sm:$0xff]  ;;  %v371_v7 = vld [vmem:[#allocation6 + $0x40] sm:$0xff]  ;;  %s899_s6 = sshll.u32 %s896_s27, 4  ;;  %s885_s7 = scalar_lea.sflag [#allocation5], %s1536_s14  ;;  %s900_s6 = int_to_ptr.hbm [resolvable:$true] %s899_s6 }
  0x2e   : > { %1039 = vmatpush.msra.mxu2 %v377_v1  ;;  %384 = vmatpush.msra.mxu0 %v377_v1  ;;  %v370_v8 = vld [vmem:[#allocation6 + $0x38] sm:$0xff]  ;;  %v369_v9 = vld [vmem:[#allocation6 + $0x30] sm:$0xff]  ;;  %v368_v10 = vld [vmem:[#allocation6 + $0x28] sm:$0xff]  ;;  %s1326_s8 = sshra.s32 %s900_s6, 4  ;;  %s1332_s26 = scalar_lea.hbm %s1700_s4, 512  ;;  %s1327_s8 = int_to_ptr.hbm [resolvable:$true] %s1326_s8 }
  0x2f   : > { %v367_v11 = vld [vmem:[#allocation6 + $0x20] sm:$0xff]  ;;  %v366_v12 = vld [vmem:[#allocation6 + $0x18] sm:$0xff]  ;;  %v365_v13 = vld [vmem:[#allocation6 + $0x10] sm:$0xff]  ;;  %s1328_s11 = scalar_lea.hbm %s1327_s8, 256  ;;  %p1333_p11 = scmp.lt.s32.totalorder %s1327_s8, %s1700_s4 }
  0x30   : > { %1040 = vmatpush.msra.mxu2 %v376_v2  ;;  %385 = vmatpush.msra.mxu0 %v376_v2  ;;  %v364_v14 = vld [vmem:[#allocation6 + $0x8] sm:$0xff]  ;;  %v363_v15 = vld [vmem:[#allocation6] sm:$0xff]  ;;  %v349_v20 = vld [vmem:[%s1542_s21 + $0x90] sm:$0xff]  ;;  %p1329_p1 = scmp.ne.s32.totalorder %s1327_s8, %s1328_s11  ;;  %p1334_p12 = scmp.lt.s32.totalorder %s1332_s26, %s1328_s11 }
  0x31   : > { %v347_v16 = vld [vmem:[%s1542_s21 + $0x80] sm:$0xff]  ;;  %v348_v18 = vld [vmem:[%s1542_s21 + $0x88] sm:$0xff]  ;;  %v333_v21 = vld [vmem:[%s1542_s21 + $0x10] sm:$0xff] }
  0x32   : > { %1041 = vmatpush.msra.mxu2 %v375_v3  ;;  %386 = vmatpush.msra.mxu0 %v375_v3  ;;  %v331_v17 = vld [vmem:[%s1542_s21] sm:$0xff]  ;;  %v332_v19 = vld [vmem:[%s1542_s21 + $0x8] sm:$0xff]  ;;  %v350_v22 = vld [vmem:[%s1542_s21 + $0x98] sm:$0xff]  ;;  %p1330_p3 = pnand %p1329_p1, %p1513_p2  ;;  %p1335_p13 = por %p1334_p12, %p1333_p11 }
  0x33   : > { %v334_v23 = vld [vmem:[%s1542_s21 + $0x18] sm:$0xff]  ;;  %v351_v24 = vld [vmem:[%s1542_s21 + $0xa0] sm:$0xff]  ;;  %v352_v26 = vld [vmem:[%s1542_s21 + $0xa8] sm:$0xff] }
  0x34   : > { %1042 = vmatpush.msra.mxu2 %v374_v4  ;;  %387 = vmatpush.msra.mxu0 %v374_v4  ;;  %v335_v25 = vld [vmem:[%s1542_s21 + $0x20] sm:$0xff]  ;;  %v336_v27 = vld [vmem:[%s1542_s21 + $0x28] sm:$0xff]  ;;  %v353_v28 = vld [vmem:[%s1542_s21 + $0xb0] sm:$0xff]  ;;  %p1331_p7 = pneg %p1330_p3 }
  0x35   : > { %v337_v29 = vld [vmem:[%s1542_s21 + $0x30] sm:$0xff]  ;;  %v354_v30 = vld [vmem:[%s1542_s21 + $0xb8] sm:$0xff]  ;;  %v355_v32 = vld [vmem:[%s1542_s21 + $0xc0] sm:$0xff] }
  0x36   : > { %1043 = vmatpush.msra.mxu2 %v373_v5  ;;  %388 = vmatpush.msra.mxu0 %v373_v5  ;;  %v338_v31 = vld [vmem:[%s1542_s21 + $0x38] sm:$0xff]  ;;  %v339_v33 = vld [vmem:[%s1542_s21 + $0x40] sm:$0xff]  ;;  %v356_v34 = vld [vmem:[%s1542_s21 + $0xc8] sm:$0xff]  ;;  %p1336_p0 = pnand %p1335_p13, %p1331_p7 }
  0x37   : > { %v340_v35 = vld [vmem:[%s1542_s21 + $0x48] sm:$0xff]  ;;  %v357_v36 = vld [vmem:[%s1542_s21 + $0xd0] sm:$0xff]  ;;  %v639_v38 = vld [vmem:[#allocation8 + $0x78] sm:$0xff] }
  0x38   : > { %1044 = vmatpush.msra.mxu2 %v372_v6  ;;  %389 = vmatpush.msra.mxu0 %v372_v6  ;;  %v341_v37 = vld [vmem:[%s1542_s21 + $0x50] sm:$0xff]  ;;  %v637_v40 = vld [vmem:[#allocation8 + $0x68] sm:$0xff]  ;;  %v358_v41 = vld [vmem:[%s1542_s21 + $0xd8] sm:$0xff] }
  0x39   : > { %v638_v39 = vld [vmem:[#allocation8 + $0x70] sm:$0xff]  ;;  %1054 = vmatpush.msra.mxu3 %v639_v38  ;;  %640 = vmatpush.msra.mxu1 %v639_v38  ;;  %v342_v42 = vld [vmem:[%s1542_s21 + $0x58] sm:$0xff]  ;;  %v636_v43 = vld [vmem:[#allocation8 + $0x60] sm:$0xff] }
  0x3a   : > { %1045 = vmatpush.msra.mxu2 %v371_v7  ;;  %390 = vmatpush.msra.mxu0 %v371_v7  ;;  %v635_v44 = vld [vmem:[#allocation8 + $0x58] sm:$0xff]  ;;  %v634_v45 = vld [vmem:[#allocation8 + $0x50] sm:$0xff]  ;;  %v633_v46 = vld [vmem:[#allocation8 + $0x48] sm:$0xff] }
  0x3b   : > { %1055 = vmatpush.msra.mxu3 %v638_v39  ;;  %641 = vmatpush.msra.mxu1 %v638_v39  ;;  %v359_v47 = vld [vmem:[%s1542_s21 + $0xe0] sm:$0xff]  ;;  %v631_v50 = vld [vmem:[#allocation8 + $0x38] sm:$0xff]  ;;  %v630_v51 = vld [vmem:[#allocation8 + $0x30] sm:$0xff] }
  0x3c   : > { %1046 = vmatpush.msra.mxu2 %v370_v8  ;;  %391 = vmatpush.msra.mxu0 %v370_v8  ;;  %v343_v48 = vld [vmem:[%s1542_s21 + $0x60] sm:$0xff]  ;;  %v360_v52 = vld [vmem:[%s1542_s21 + $0xe8] sm:$0xff]  ;;  %v627_v56 = vld [vmem:[#allocation8 + $0x18] sm:$0xff] }
  0x3d   : > { %1056 = vmatpush.msra.mxu3 %v637_v40  ;;  %642 = vmatpush.msra.mxu1 %v637_v40  ;;  %v632_v49 = vld [vmem:[#allocation8 + $0x40] sm:$0xff]  ;;  %v344_v53 = vld [vmem:[%s1542_s21 + $0x68] sm:$0xff]  ;;  %v626_v57 = vld [vmem:[#allocation8 + $0x10] sm:$0xff] }
  0x3e   : > { %1047 = vmatpush.msra.mxu2 %v369_v9  ;;  %392 = vmatpush.msra.mxu0 %v369_v9  ;;  %v629_v54 = vld [vmem:[#allocation8 + $0x28] sm:$0xff]  ;;  %v628_v55 = vld [vmem:[#allocation8 + $0x20] sm:$0xff]  ;;  %v361_v58 = vld [vmem:[%s1542_s21 + $0xf0] sm:$0xff] }
  0x3f   : > { %1057 = vmatpush.msra.mxu3 %v636_v43  ;;  %643 = vmatpush.msra.mxu1 %v636_v43  ;;  %v345_v59 = vld [vmem:[%s1542_s21 + $0x70] sm:$0xff]  ;;  %v625_v60 = vld [vmem:[#allocation8 + $0x8] sm:$0xff]  ;;  %v624_v61 = vld [vmem:[#allocation8] sm:$0xff] }
  0x40   : > { %1048 = vmatpush.msra.mxu2 %v368_v10  ;;  %393 = vmatpush.msra.mxu0 %v368_v10  ;;  %v362_v62 = vld [vmem:[%s1542_s21 + $0xf8] sm:$0xff]  ;;  %v1587_v0 = vld [vmem:[%s1699_s3] ss:$0 sm:$0xff] }
  0x41   : > { %1058 = vmatpush.msra.mxu3 %v635_v44  ;;  %644 = vmatpush.msra.mxu1 %v635_v44  ;;  %v346_v63 = vld [vmem:[%s1542_s21 + $0x78] sm:$0xff] }
  0x42   : > { %1049 = vmatpush.msra.mxu2 %v367_v11  ;;  %394 = vmatpush.msra.mxu0 %v367_v11 }
  0x43   : > { %1059 = vmatpush.msra.mxu3 %v634_v45  ;;  %645 = vmatpush.msra.mxu1 %v634_v45 }
  0x44   : > { %1050 = vmatpush.msra.mxu2 %v366_v12  ;;  %395 = vmatpush.msra.mxu0 %v366_v12 }
  0x45   : > { %1060 = vmatpush.msra.mxu3 %v633_v46  ;;  %646 = vmatpush.msra.mxu1 %v633_v46 }
  0x46   : > { %1051 = vmatpush.msra.mxu2 %v365_v13  ;;  %396 = vmatpush.msra.mxu0 %v365_v13 }
  0x47   : > { %1061 = vmatpush.msra.mxu3 %v632_v49  ;;  %647 = vmatpush.msra.mxu1 %v632_v49 }
  0x48   : > { %1052 = vmatpush.msra.mxu2 %v364_v14  ;;  %397 = vmatpush.msra.mxu0 %v364_v14 }
  0x49   : > { %1062 = vmatpush.msra.mxu3 %v631_v50  ;;  %648 = vmatpush.msra.mxu1 %v631_v50 }
  0x4a   : > { %1053 = vmatpush.msra.mxu2 %v363_v15  ;;  %398 = vmatpush.msra.mxu0 %v363_v15 }
  0x4b   : > { %447 = vmatmul.f32.vlgmr.msra.gmra.mxu2 %v347_v16  ;;  %399 = vmatmul.f32.vlgmr.msra.gmra.mxu0 %v331_v17 }
  0x4c   : > { %1063 = vmatpush.msra.mxu3 %v630_v51  ;;  %649 = vmatpush.msra.mxu1 %v630_v51 }
  0x4e   : > { %1064 = vmatpush.msra.mxu3 %v629_v54  ;;  %650 = vmatpush.msra.mxu1 %v629_v54 }
  0x50   : > { %1065 = vmatpush.msra.mxu3 %v628_v55  ;;  %651 = vmatpush.msra.mxu1 %v628_v55 }
  0x52   : > { %1066 = vmatpush.msra.mxu3 %v627_v56  ;;  %652 = vmatpush.msra.mxu1 %v627_v56 }
  0x53   : > { %450 = vmatmul.f32.gmra.mxu2 %v348_v18  ;;  %402 = vmatmul.f32.gmra.mxu0 %v332_v19 }
  0x54   : > { %1067 = vmatpush.msra.mxu3 %v626_v57  ;;  %653 = vmatpush.msra.mxu1 %v626_v57 }
  0x56   : > { %1068 = vmatpush.msra.mxu3 %v625_v60  ;;  %654 = vmatpush.msra.mxu1 %v625_v60 }
  0x58   : > { %1069 = vmatpush.msra.mxu3 %v624_v61  ;;  %655 = vmatpush.msra.mxu1 %v624_v61 }
  0x5b   : > { %453 = vmatmul.f32.gmra.mxu2 %v349_v20  ;;  %405 = vmatmul.f32.gmra.mxu0 %v333_v21 }
  0x63   : > { %456 = vmatmul.f32.gmra.mxu2 %v350_v22  ;;  %408 = vmatmul.f32.gmra.mxu0 %v334_v23 }
  0x6b   : > { %459 = vmatmul.f32.gmra.mxu2 %v351_v24  ;;  %411 = vmatmul.f32.gmra.mxu0 %v335_v25 }
  0x73   : > { %462 = vmatmul.f32.gmra.mxu2 %v352_v26  ;;  %414 = vmatmul.f32.gmra.mxu0 %v336_v27 }
  0x7b   : > { %465 = vmatmul.f32.gmra.mxu2 %v353_v28  ;;  %417 = vmatmul.f32.gmra.mxu0 %v337_v29 }
  0x83   : > { %468 = vmatmul.f32.gmra.mxu2 %v354_v30  ;;  %420 = vmatmul.f32.gmra.mxu0 %v338_v31 }
  0x8b   : > { %471 = vmatmul.f32.gmra.mxu2 %v355_v32  ;;  %423 = vmatmul.f32.gmra.mxu0 %v339_v33 }
  0x93   : > { %474 = vmatmul.f32.gmra.mxu2 %v356_v34  ;;  %426 = vmatmul.f32.gmra.mxu0 %v340_v35 }
  0x9b   : > { %477 = vmatmul.f32.gmra.mxu2 %v357_v36  ;;  %429 = vmatmul.f32.gmra.mxu0 %v341_v37 }
  0xa3   : > { %480 = vmatmul.f32.gmra.mxu2 %v358_v41  ;;  %432 = vmatmul.f32.gmra.mxu0 %v342_v42 }
  0xab   : > { %483 = vmatmul.f32.gmra.mxu2 %v359_v47  ;;  %435 = vmatmul.f32.gmra.mxu0 %v343_v48 }
  0xb3   : > { %486 = vmatmul.f32.gmra.mxu2 %v360_v52  ;;  %438 = vmatmul.f32.gmra.mxu0 %v344_v53 }
  0xbb   : > { %489 = vmatmul.f32.gmra.mxu2 %v361_v58  ;;  %441 = vmatmul.f32.gmra.mxu0 %v345_v59 }
  0xc3   : > { %492 = vmatmul.f32.gmra.mxu2 %v362_v62  ;;  %444 = vmatmul.f32.gmra.mxu0 %v346_v63 }
  0xc8   : > { %v400_v1 = vpop.f32.mrf.mxu0 }
  0xc9   : > { %v401_v2 = vadd.f32 %v1587_v0, %v400_v1 }
  0xcb   : > { %1158 = vtanh.f32 %v401_v2 }
  0xce   : > { %v448_v3 = vpop.f32.mrf.mxu2 }
  0xcf   : > { %v449_v4 = vadd.f32 %v1587_v0, %v448_v3 }
  0xd0   : > { %v403_v5 = vpop.f32.mrf.mxu0 }
  0xd1   : > { %v1159_v6 = vpop.eup %1158  ;;  %1160 = vtanh.f32 %v449_v4  ;;  %v404_v7 = vadd.f32 %v1587_v0, %v403_v5 }
  0xd2   : > { %v528_v8 = vmul.f32 %v1159_v6, %v1159_v6 }
  0xd3   : > { %1162 = vtanh.f32 %v404_v7 }
  0xd4   : > { %v560_v9 = vsub.f32 1.0, %v528_v8 }
  0xd6   : > { %v451_v10 = vpop.f32.mrf.mxu2  ;;  %656 = vmatmul.f32.vlgmr.msra.gmra.mxu1 %v560_v9 }
  0xd7   : > { %v1161_v11 = vpop.eup %1160  ;;  %v452_v12 = vadd.f32 %v1587_v0, %v451_v10 }
  0xd8   : > { %v544_v13 = vmul.f32 %v1161_v11, %v1161_v11  ;;  %v406_v14 = vpop.f32.mrf.mxu0 }
  0xd9   : > { %v1163_v15 = vpop.eup %1162  ;;  %1164 = vtanh.f32 %v452_v12  ;;  %v407_v16 = vadd.f32 %v1587_v0, %v406_v14 }
  0xda   : > { %v576_v17 = vsub.f32 1.0, %v544_v13  ;;  %v529_v18 = vmul.f32 %v1163_v15, %v1163_v15 }
  0xdb   : > { %1166 = vtanh.f32 %v407_v16 }
  0xdc   : > { %704 = vmatmul.f32.vlgmr.msra.gmra.mxu3 %v576_v17  ;;  %v561_v19 = vsub.f32 1.0, %v529_v18 }
  0xde   : > { %v454_v20 = vpop.f32.mrf.mxu2  ;;  %659 = vmatmul.f32.gmra.mxu1 %v561_v19 }
  0xdf   : > { %v1165_v21 = vpop.eup %1164  ;;  %v455_v22 = vadd.f32 %v1587_v0, %v454_v20 }
  0xe0   : > { %v545_v23 = vmul.f32 %v1165_v21, %v1165_v21  ;;  %v409_v24 = vpop.f32.mrf.mxu0 }
  0xe1   : > { %v1167_v25 = vpop.eup %1166  ;;  %1168 = vtanh.f32 %v455_v22  ;;  %v410_v26 = vadd.f32 %v1587_v0, %v409_v24 }
  0xe2   : > { %v577_v27 = vsub.f32 1.0, %v545_v23  ;;  %v530_v28 = vmul.f32 %v1167_v25, %v1167_v25 }
  0xe3   : > { %1170 = vtanh.f32 %v410_v26 }
  0xe4   : > { %707 = vmatmul.f32.gmra.mxu3 %v577_v27  ;;  %v562_v29 = vsub.f32 1.0, %v530_v28 }
  0xe6   : > { %v457_v30 = vpop.f32.mrf.mxu2  ;;  %662 = vmatmul.f32.gmra.mxu1 %v562_v29 }
  0xe7   : > { %v1169_v31 = vpop.eup %1168  ;;  %v458_v32 = vadd.f32 %v1587_v0, %v457_v30 }
  0xe8   : > { %v546_v33 = vmul.f32 %v1169_v31, %v1169_v31  ;;  %v412_v34 = vpop.f32.mrf.mxu0 }
  0xe9   : > { %v1171_v35 = vpop.eup %1170  ;;  %1172 = vtanh.f32 %v458_v32  ;;  %v413_v36 = vadd.f32 %v1587_v0, %v412_v34 }
  0xea   : > { %v578_v37 = vsub.f32 1.0, %v546_v33  ;;  %v531_v38 = vmul.f32 %v1171_v35, %v1171_v35 }
  0xeb   : > { %1174 = vtanh.f32 %v413_v36 }
  0xec   : > { %710 = vmatmul.f32.gmra.mxu3 %v578_v37  ;;  %v563_v39 = vsub.f32 1.0, %v531_v38 }
  0xee   : > { %v460_v40 = vpop.f32.mrf.mxu2  ;;  %665 = vmatmul.f32.gmra.mxu1 %v563_v39 }
  0xef   : > { %v1173_v41 = vpop.eup %1172  ;;  %v461_v42 = vadd.f32 %v1587_v0, %v460_v40 }
  0xf0   : > { %v547_v43 = vmul.f32 %v1173_v41, %v1173_v41  ;;  %v415_v44 = vpop.f32.mrf.mxu0 }
  0xf1   : > { %v1175_v45 = vpop.eup %1174  ;;  %1176 = vtanh.f32 %v461_v42  ;;  %v416_v46 = vadd.f32 %v1587_v0, %v415_v44 }
  0xf2   : > { %v579_v47 = vsub.f32 1.0, %v547_v43  ;;  %v532_v48 = vmul.f32 %v1175_v45, %v1175_v45 }
  0xf3   : > { %1178 = vtanh.f32 %v416_v46 }
  0xf4   : > { %713 = vmatmul.f32.gmra.mxu3 %v579_v47  ;;  %v564_v49 = vsub.f32 1.0, %v532_v48 }
  0xf6   : > { %v463_v50 = vpop.f32.mrf.mxu2  ;;  %668 = vmatmul.f32.gmra.mxu1 %v564_v49 }
  0xf7   : > { %v1177_v51 = vpop.eup %1176  ;;  %v464_v52 = vadd.f32 %v1587_v0, %v463_v50 }
  0xf8   : > { %v548_v53 = vmul.f32 %v1177_v51, %v1177_v51  ;;  %v418_v54 = vpop.f32.mrf.mxu0 }
  0xf9   : > { %v1179_v55 = vpop.eup %1178  ;;  %1180 = vtanh.f32 %v464_v52  ;;  %v419_v56 = vadd.f32 %v1587_v0, %v418_v54 }
  0xfa   : > { %v580_v57 = vsub.f32 1.0, %v548_v53  ;;  %v533_v58 = vmul.f32 %v1179_v55, %v1179_v55 }
  0xfb   : > { %1182 = vtanh.f32 %v419_v56 }
  0xfc   : > { %716 = vmatmul.f32.gmra.mxu3 %v580_v57  ;;  %v565_v59 = vsub.f32 1.0, %v533_v58 }
  0xfe   : > { %v466_v60 = vpop.f32.mrf.mxu2  ;;  %671 = vmatmul.f32.gmra.mxu1 %v565_v59 }
  0xff   : > { %v1181_v61 = vpop.eup %1180  ;;  %v467_v62 = vadd.f32 %v1587_v0, %v466_v60 }
 0x100   : > { %v549_v63 = vmul.f32 %v1181_v61, %v1181_v61  ;;  %v421_v1 = vpop.f32.mrf.mxu0 }
 0x101   : > { %v1183_v2 = vpop.eup %1182  ;;  %1184 = vtanh.f32 %v467_v62  ;;  %v422_v3 = vadd.f32 %v1587_v0, %v421_v1 }
 0x102   : > { %v581_v4 = vsub.f32 1.0, %v549_v63  ;;  %v534_v5 = vmul.f32 %v1183_v2, %v1183_v2 }
 0x103   : > { %1186 = vtanh.f32 %v422_v3 }
 0x104   : > { %719 = vmatmul.f32.gmra.mxu3 %v581_v4  ;;  %v566_v6 = vsub.f32 1.0, %v534_v5 }
 0x106   : > { %v469_v7 = vpop.f32.mrf.mxu2  ;;  %674 = vmatmul.f32.gmra.mxu1 %v566_v6 }
 0x107   : > { %v1185_v8 = vpop.eup %1184  ;;  %v470_v9 = vadd.f32 %v1587_v0, %v469_v7 }
 0x108   : > { %v550_v10 = vmul.f32 %v1185_v8, %v1185_v8  ;;  %v424_v11 = vpop.f32.mrf.mxu0 }
 0x109   : > { %v1187_v12 = vpop.eup %1186  ;;  %1188 = vtanh.f32 %v470_v9  ;;  %v425_v13 = vadd.f32 %v1587_v0, %v424_v11 }
 0x10a   : > { %v582_v14 = vsub.f32 1.0, %v550_v10  ;;  %v535_v15 = vmul.f32 %v1187_v12, %v1187_v12 }
 0x10b   : > { %1190 = vtanh.f32 %v425_v13 }
 0x10c   : > { %722 = vmatmul.f32.gmra.mxu3 %v582_v14  ;;  %v567_v16 = vsub.f32 1.0, %v535_v15 }
 0x10e   : > { %v472_v17 = vpop.f32.mrf.mxu2  ;;  %677 = vmatmul.f32.gmra.mxu1 %v567_v16 }
 0x10f   : > { %v1189_v18 = vpop.eup %1188  ;;  %v473_v19 = vadd.f32 %v1587_v0, %v472_v17 }
 0x110   : > { %v551_v20 = vmul.f32 %v1189_v18, %v1189_v18  ;;  %v427_v21 = vpop.f32.mrf.mxu0 }
 0x111   : > { %v1191_v22 = vpop.eup %1190  ;;  %1192 = vtanh.f32 %v473_v19  ;;  %v428_v23 = vadd.f32 %v1587_v0, %v427_v21 }
 0x112   : > { %v583_v24 = vsub.f32 1.0, %v551_v20  ;;  %v536_v25 = vmul.f32 %v1191_v22, %v1191_v22 }
 0x113   : > { %1194 = vtanh.f32 %v428_v23 }
 0x114   : > { %725 = vmatmul.f32.gmra.mxu3 %v583_v24  ;;  %v568_v26 = vsub.f32 1.0, %v536_v25 }
 0x116   : > { %v475_v27 = vpop.f32.mrf.mxu2  ;;  %680 = vmatmul.f32.gmra.mxu1 %v568_v26 }
 0x117   : > { %v1193_v28 = vpop.eup %1192  ;;  %v476_v29 = vadd.f32 %v1587_v0, %v475_v27 }
 0x118   : > { %v552_v30 = vmul.f32 %v1193_v28, %v1193_v28  ;;  %v430_v31 = vpop.f32.mrf.mxu0 }
 0x119   : > { %v1195_v32 = vpop.eup %1194  ;;  %1196 = vtanh.f32 %v476_v29  ;;  %v431_v33 = vadd.f32 %v1587_v0, %v430_v31 }
 0x11a   : > { %v584_v34 = vsub.f32 1.0, %v552_v30  ;;  %v537_v35 = vmul.f32 %v1195_v32, %v1195_v32 }
 0x11b   : > { %1198 = vtanh.f32 %v431_v33 }
 0x11c   : > { %728 = vmatmul.f32.gmra.mxu3 %v584_v34  ;;  %v569_v36 = vsub.f32 1.0, %v537_v35 }
 0x11e   : > { %v478_v37 = vpop.f32.mrf.mxu2  ;;  %683 = vmatmul.f32.gmra.mxu1 %v569_v36 }
 0x11f   : > { %v1197_v38 = vpop.eup %1196  ;;  %v479_v39 = vadd.f32 %v1587_v0, %v478_v37 }
 0x120   : > { %v553_v40 = vmul.f32 %v1197_v38, %v1197_v38  ;;  %v433_v41 = vpop.f32.mrf.mxu0 }
 0x121   : > { %v1199_v42 = vpop.eup %1198  ;;  %1200 = vtanh.f32 %v479_v39  ;;  %v434_v43 = vadd.f32 %v1587_v0, %v433_v41 }
 0x122   : > { %v585_v44 = vsub.f32 1.0, %v553_v40  ;;  %v538_v45 = vmul.f32 %v1199_v42, %v1199_v42 }
 0x123   : > { %1202 = vtanh.f32 %v434_v43 }
 0x124   : > { %731 = vmatmul.f32.gmra.mxu3 %v585_v44  ;;  %v570_v46 = vsub.f32 1.0, %v538_v45 }
 0x126   : > { %v481_v47 = vpop.f32.mrf.mxu2  ;;  %686 = vmatmul.f32.gmra.mxu1 %v570_v46 }
 0x127   : > { %v1201_v48 = vpop.eup %1200  ;;  %v482_v49 = vadd.f32 %v1587_v0, %v481_v47 }
 0x128   : > { %v554_v50 = vmul.f32 %v1201_v48, %v1201_v48  ;;  %v436_v51 = vpop.f32.mrf.mxu0 }
 0x129   : > { %v1203_v52 = vpop.eup %1202  ;;  %1204 = vtanh.f32 %v482_v49  ;;  %v437_v53 = vadd.f32 %v1587_v0, %v436_v51 }
 0x12a   : > { %v586_v54 = vsub.f32 1.0, %v554_v50  ;;  %v539_v55 = vmul.f32 %v1203_v52, %v1203_v52 }
 0x12b   : > { %1206 = vtanh.f32 %v437_v53 }
 0x12c   : > { %734 = vmatmul.f32.gmra.mxu3 %v586_v54  ;;  %v571_v56 = vsub.f32 1.0, %v539_v55 }
 0x12e   : > { %v484_v57 = vpop.f32.mrf.mxu2  ;;  %689 = vmatmul.f32.gmra.mxu1 %v571_v56 }
 0x12f   : > { %v1205_v58 = vpop.eup %1204  ;;  %v485_v59 = vadd.f32 %v1587_v0, %v484_v57 }
 0x130   : > { %v555_v60 = vmul.f32 %v1205_v58, %v1205_v58  ;;  %v439_v61 = vpop.f32.mrf.mxu0 }
 0x131   : > { %v1207_v62 = vpop.eup %1206  ;;  %1208 = vtanh.f32 %v485_v59  ;;  %v440_v63 = vadd.f32 %v1587_v0, %v439_v61 }
 0x132   : > { %v587_v1 = vsub.f32 1.0, %v555_v60  ;;  %v540_v2 = vmul.f32 %v1207_v62, %v1207_v62 }
 0x133   : > { %1210 = vtanh.f32 %v440_v63 }
 0x134   : > { %737 = vmatmul.f32.gmra.mxu3 %v587_v1  ;;  %v572_v3 = vsub.f32 1.0, %v540_v2 }
 0x136   : > { %v487_v4 = vpop.f32.mrf.mxu2  ;;  %692 = vmatmul.f32.gmra.mxu1 %v572_v3 }
 0x137   : > { %v1209_v5 = vpop.eup %1208  ;;  %v488_v6 = vadd.f32 %v1587_v0, %v487_v4 }
 0x138   : > { %v556_v7 = vmul.f32 %v1209_v5, %v1209_v5  ;;  %v442_v8 = vpop.f32.mrf.mxu0 }
 0x139   : > { %v1211_v9 = vpop.eup %1210  ;;  %1212 = vtanh.f32 %v488_v6  ;;  %v443_v10 = vadd.f32 %v1587_v0, %v442_v8 }
 0x13a   : > { %v588_v11 = vsub.f32 1.0, %v556_v7  ;;  %v541_v12 = vmul.f32 %v1211_v9, %v1211_v9 }
 0x13b   : > { %1214 = vtanh.f32 %v443_v10 }
 0x13c   : > { %740 = vmatmul.f32.gmra.mxu3 %v588_v11  ;;  %v573_v13 = vsub.f32 1.0, %v541_v12 }
 0x13e   : > { %v490_v14 = vpop.f32.mrf.mxu2  ;;  %695 = vmatmul.f32.gmra.mxu1 %v573_v13 }
 0x13f   : > { %v1213_v15 = vpop.eup %1212  ;;  %v491_v16 = vadd.f32 %v1587_v0, %v490_v14 }
 0x140   : > { %v557_v17 = vmul.f32 %v1213_v15, %v1213_v15  ;;  %v445_v18 = vpop.f32.mrf.mxu0 }
 0x141   : > { %v1215_v19 = vpop.eup %1214  ;;  %1216 = vtanh.f32 %v491_v16  ;;  %v446_v20 = vadd.f32 %v1587_v0, %v445_v18 }
 0x142   : > { %v589_v21 = vsub.f32 1.0, %v557_v17  ;;  %v542_v22 = vmul.f32 %v1215_v19, %v1215_v19 }
 0x143   : > { %1218 = vtanh.f32 %v446_v20 }
 0x144   : > { %743 = vmatmul.f32.gmra.mxu3 %v589_v21  ;;  %v574_v23 = vsub.f32 1.0, %v542_v22 }
 0x146   : > { %v493_v24 = vpop.f32.mrf.mxu2  ;;  %698 = vmatmul.f32.gmra.mxu1 %v574_v23 }
 0x147   : > { %v1217_v25 = vpop.eup %1216  ;;  %v494_v26 = vadd.f32 %v1587_v0, %v493_v24 }
 0x148   : > { %v558_v27 = vmul.f32 %v1217_v25, %v1217_v25 }
 0x149   : > { %v1219_v28 = vpop.eup %1218  ;;  %1220 = vtanh.f32 %v494_v26 }
 0x14a   : > { %v590_v29 = vsub.f32 1.0, %v558_v27  ;;  %v543_v30 = vmul.f32 %v1219_v28, %v1219_v28 }
 0x14c   : > { %746 = vmatmul.f32.gmra.mxu3 %v590_v29  ;;  %v575_v31 = vsub.f32 1.0, %v543_v30 }
 0x14e   : > { %701 = vmatmul.f32.gmra.mxu1 %v575_v31 }
 0x14f   : > { %v1221_v32 = vpop.eup %1220 }
 0x150   : > { %v559_v33 = vmul.f32 %v1221_v32, %v1221_v32 }
 0x152   : > { %v591_v34 = vsub.f32 1.0, %v559_v33 }
 0x153   : > { %v657_v35 = vpop.f32.mrf.mxu1 }
 0x154   : > { %749 = vmatmul.f32.gmra.mxu3 %v591_v34  ;;  %852 = vst [vmem:[%s1623_s24] sm:$0xff] %v657_v35 }
 0x15b   : > { %v660_v0 = vpop.f32.mrf.mxu1 }
 0x15c   : > { %853 = vst [vmem:[%s1623_s24 + $0x8] sm:$0xff] %v660_v0 }
 0x15f   : > { %v705_v36 = vpop.f32.mrf.mxu3 }
 0x160   : > { %868 = vst [vmem:[%s1623_s24 + $0x80] sm:$0xff] %v705_v36 }
 0x163   : > { %v663_v37 = vpop.f32.mrf.mxu1 }
 0x164   : > { %854 = vst [vmem:[%s1623_s24 + $0x10] sm:$0xff] %v663_v37 }
 0x167   : > { %v708_v38 = vpop.f32.mrf.mxu3 }
 0x168   : > { %869 = vst [vmem:[%s1623_s24 + $0x88] sm:$0xff] %v708_v38 }
 0x16b   : > { %v666_v39 = vpop.f32.mrf.mxu1 }
 0x16c   : > { %855 = vst [vmem:[%s1623_s24 + $0x18] sm:$0xff] %v666_v39 }
 0x16f   : > { %v711_v40 = vpop.f32.mrf.mxu3 }
 0x170   : > { %870 = vst [vmem:[%s1623_s24 + $0x90] sm:$0xff] %v711_v40 }
 0x173   : > { %v669_v41 = vpop.f32.mrf.mxu1 }
 0x174   : > { %856 = vst [vmem:[%s1623_s24 + $0x20] sm:$0xff] %v669_v41 }
 0x177   : > { %v714_v42 = vpop.f32.mrf.mxu3 }
 0x178   : > { %871 = vst [vmem:[%s1623_s24 + $0x98] sm:$0xff] %v714_v42 }
 0x17b   : > { %v672_v43 = vpop.f32.mrf.mxu1 }
 0x17c   : > { %857 = vst [vmem:[%s1623_s24 + $0x28] sm:$0xff] %v672_v43 }
 0x17f   : > { %v717_v44 = vpop.f32.mrf.mxu3 }
 0x180   : > { %872 = vst [vmem:[%s1623_s24 + $0xa0] sm:$0xff] %v717_v44 }
 0x183   : > { %v675_v45 = vpop.f32.mrf.mxu1 }
 0x184   : > { %858 = vst [vmem:[%s1623_s24 + $0x30] sm:$0xff] %v675_v45 }
 0x187   : > { %v720_v46 = vpop.f32.mrf.mxu3 }
 0x188   : > { %873 = vst [vmem:[%s1623_s24 + $0xa8] sm:$0xff] %v720_v46 }
 0x18b   : > { %v678_v47 = vpop.f32.mrf.mxu1 }
 0x18c   : > { %859 = vst [vmem:[%s1623_s24 + $0x38] sm:$0xff] %v678_v47 }
 0x18f   : > { %v723_v48 = vpop.f32.mrf.mxu3 }
 0x190   : > { %874 = vst [vmem:[%s1623_s24 + $0xb0] sm:$0xff] %v723_v48 }
 0x193   : > { %v681_v49 = vpop.f32.mrf.mxu1 }
 0x194   : > { %860 = vst [vmem:[%s1623_s24 + $0x40] sm:$0xff] %v681_v49 }
 0x197   : > { %v726_v50 = vpop.f32.mrf.mxu3 }
 0x198   : > { %875 = vst [vmem:[%s1623_s24 + $0xb8] sm:$0xff] %v726_v50 }
 0x19b   : > { %v684_v51 = vpop.f32.mrf.mxu1 }
 0x19c   : > { %861 = vst [vmem:[%s1623_s24 + $0x48] sm:$0xff] %v684_v51 }
 0x19f   : > { %v729_v52 = vpop.f32.mrf.mxu3 }
 0x1a0   : > { %876 = vst [vmem:[%s1623_s24 + $0xc0] sm:$0xff] %v729_v52 }
 0x1a3   : > { %v687_v53 = vpop.f32.mrf.mxu1 }
 0x1a4   : > { %862 = vst [vmem:[%s1623_s24 + $0x50] sm:$0xff] %v687_v53 }
 0x1a7   : > { %v732_v54 = vpop.f32.mrf.mxu3 }
 0x1a8   : > { %877 = vst [vmem:[%s1623_s24 + $0xc8] sm:$0xff] %v732_v54 }
 0x1ab   : > { %v690_v55 = vpop.f32.mrf.mxu1 }
 0x1ac   : > { %863 = vst [vmem:[%s1623_s24 + $0x58] sm:$0xff] %v690_v55 }
 0x1af   : > { %v735_v56 = vpop.f32.mrf.mxu3 }
 0x1b0   : > { %878 = vst [vmem:[%s1623_s24 + $0xd0] sm:$0xff] %v735_v56 }
 0x1b3   : > { %v693_v57 = vpop.f32.mrf.mxu1 }
 0x1b4   : > { %864 = vst [vmem:[%s1623_s24 + $0x60] sm:$0xff] %v693_v57 }
 0x1b7   : > { %v738_v58 = vpop.f32.mrf.mxu3 }
 0x1b8   : > { %879 = vst [vmem:[%s1623_s24 + $0xd8] sm:$0xff] %v738_v58 }
 0x1bb   : > { %v696_v59 = vpop.f32.mrf.mxu1 }
 0x1bc   : > { %865 = vst [vmem:[%s1623_s24 + $0x68] sm:$0xff] %v696_v59 }
 0x1bf   : > { %v741_v60 = vpop.f32.mrf.mxu3 }
 0x1c0   : > { %880 = vst [vmem:[%s1623_s24 + $0xe0] sm:$0xff] %v741_v60 }
 0x1c3   : > { %v699_v61 = vpop.f32.mrf.mxu1 }
 0x1c4   : > { %866 = vst [vmem:[%s1623_s24 + $0x70] sm:$0xff] %v699_v61 }
 0x1c7   : > { %v744_v62 = vpop.f32.mrf.mxu3 }
 0x1c8   : > { %881 = vst [vmem:[%s1623_s24 + $0xe8] sm:$0xff] %v744_v62 }
 0x1cb   : > { %v702_v63 = vpop.f32.mrf.mxu1 }
 0x1cc   : > { %867 = vst [vmem:[%s1623_s24 + $0x78] sm:$0xff] %v702_v63 }
 0x1cf   : > { %v747_v1 = vpop.f32.mrf.mxu3 }
 0x1d0   : > { %882 = vst [vmem:[%s1623_s24 + $0xf0] sm:$0xff] %v747_v1 }
 0x1d7   : > { %v750_v2 = vpop.f32.mrf.mxu3 }
 0x1d8   : > { %883 = vst [vmem:[%s1623_s24 + $0xf8] sm:$0xff] %v750_v2 }
 0x1d9   : > { %1339 = shalt.err (!%p1336_p0)
}
 0x1da   : > { %s1404_s14 = smov 128   ;;  %s1405_s1 = smov 8  }
 0x1db   : > { %1080 = dma.vmem_to_hbm [thread:$0]  (%p1513_p2), %s898_s5, 4096, %s900_s6, %s885_s7, %s1404_s14, %s1404_s14, %s1405_s1  }
 0x1dc PF: > { %s914_s23 = sand.u32 1, %s1378_s15   ;;  %p1094_p4 = pnand %p1022_p10, %p1478_p5 }
 0x1dd   : > { %s915_s24 = scalar_lea.sflag [#allocation5], %s914_s23 }
 0x1de   : > { %p1095_p6 = pneg %p1094_p4 }
 0x1e0   : > { %1373 = dma.done.wait (%p1095_p6), %s915_s24, 4096  }
 0x1e1   : > { %1375 = vsyncadd (%p1095_p6), %s915_s24, 4294963200  ;;  %s21_s20 = sadd.s32 1, %s1398_s20   ;;  %s1710_s15 = smov %s1382_s16 }
 0x1e2   : > { %p18_p8 = scmp.ge.s32.totalorder %s21_s20, 4   ;;  %s1711_s16 = smov %s1386_s17 }
 0x1e3   : > { %s1712_s17 = smov %s1523_s30  ;;  %s1713_s18 = smov %s1394_s19 }
 0x1e4   : > { %s1714_s19 = smov %s1716_s13  ;;  %20 = sbr.rel (!%p18_p8) target bundleno = 9 (0x9), region = 102 }
 0x1e9   :  { %921 = vsyncpa [#allocation4], 1 }
 0x1ea   :  { %923 = vsyncpa [#allocation4 + $0x1], 1 }
 0x1eb   :  { %924 = vsyncpa [#allocation7], 1 }
 0x1ec   :  { %925 = vsyncpa [#allocation5], 1 }
 0x1ed   :  { %927 = vsyncpa [#allocation5 + $0x1], 1 }

</bundles_post_ra>
